<compile_context>
chip_gen: v7x
topology: tpu7x:2x2x1
jax: 0.10.0
libtpu: 0.0.40
codegen_flags: <defaults>
</compile_context>

<pallas_src>
from collections import OrderedDict

import jax
import jax.numpy as jnp
import numpy as np
from jax.experimental import pallas as pl
from jax.experimental.pallas import tpu as pltpu

_LANE = 128
_SUBLANE = 8
_VMEM_LIMIT = 32 * 1024 * 1024  # explicit budget; safe on v5e/v6e/v7x


def _round_up(x, m):
    return ((x + m - 1) // m) * m


# ----------------------------- Pallas kernels -----------------------------

def _lateral_kernel(x_ref, w_ref, b_ref, o_ref):
    # x_ref: (TM, Cin_p) f32; w_ref: (Cin_p, Cout_p) bf16; b_ref: (1, Cout_p) f32
    acc = jnp.dot(x_ref[...].astype(jnp.bfloat16), w_ref[...],
                  preferred_element_type=jnp.float32)
    o_ref[...] = (acc + b_ref[...]).astype(o_ref.dtype)


def _lateral_add_kernel(x_ref, w_ref, b_ref, td_ref, o_ref):
    # Fused 1x1 lateral conv + bias + top-down merge (replaces separate add kernel).
    acc = jnp.dot(x_ref[...].astype(jnp.bfloat16), w_ref[...],
                  preferred_element_type=jnp.float32)
    o_ref[...] = (acc + b_ref[...] + td_ref[...]).astype(o_ref.dtype)


def _conv3x3_kernel(x_ref, w_ref, b_ref, o_ref):
    # x_ref: (th+2, Wp, Cp) halo tile (f32, VMEM-resident)
    # w_ref: (9*Cp, Cout_p) bf16 ; b_ref: (1, Cout_p) f32 ; o_ref: (th, W8, Cout_p)
    th, w8, coutp = o_ref.shape
    cp = x_ref.shape[-1]
    tile = x_ref[...]
    # im2col on the VMEM tile -> single deep-K matmul (K = 9*Cp) on the MXU.
    taps = [tile[kh:kh + th, kw:kw + w8, :].reshape(th * w8, cp)
            for kh in range(3) for kw in range(3)]
    lhs = jnp.concatenate(taps, axis=-1).astype(jnp.bfloat16)   # (th*W8, 9*Cp)
    acc = jnp.dot(lhs, w_ref[...], preferred_element_type=jnp.float32)
    o_ref[...] = (acc + b_ref[...]).reshape(th, w8, coutp).astype(o_ref.dtype)


# ------------------------------ Pallas wrappers ----------------------------

def lateral_conv_pallas(x_nhwc, w, b, coutp, top_down=None, tile_m=256):
    """Fused 1x1 conv + bias (+ optional top-down add) over flattened pixels.

    x_nhwc: (N,H,W,Cin) f32; w: (Cin,Cout) f32; b: (Cout,) f32;
    top_down: optional (N,H,W,coutp) f32 (already channel-padded).
    Returns (N,H,W,coutp) f32 (channels beyond Cout are exactly zero).
    """
    n, h, wd, cin = x_nhwc.shape
    cinp = _round_up(cin, _LANE)
    m = n * h * wd
    tm = tile_m if m >= tile_m else _round_up(m, _SUBLANE)
    m_pad = _round_up(m, tm)

    xf = jnp.pad(x_nhwc.reshape(m, cin), ((0, m_pad - m), (0, cinp - cin)))
    wp = jnp.pad(w, ((0, cinp - cin), (0, coutp - w.shape[1]))).astype(jnp.bfloat16)
    bp = jnp.pad(b, (0, coutp - b.shape[0])).reshape(1, coutp).astype(jnp.float32)

    in_specs = [
        pl.BlockSpec((tm, cinp), lambda i: (i, 0)),       # activations: tiled over M
        pl.BlockSpec((cinp, coutp), lambda i: (0, 0)),    # weights: grid-invariant
        pl.BlockSpec((1, coutp), lambda i: (0, 0)),       # bias: grid-invariant
    ]
    args = [xf, wp, bp]
    kernel = _lateral_kernel
    if top_down is not None:
        tdf = jnp.pad(top_down.reshape(m, coutp), ((0, m_pad - m), (0, 0)))
        in_specs.append(pl.BlockSpec((tm, coutp), lambda i: (i, 0)))
        args.append(tdf)
        kernel = _lateral_add_kernel

    out = pl.pallas_call(
        kernel,
        out_shape=jax.ShapeDtypeStruct((m_pad, coutp), x_nhwc.dtype),
        grid=(m_pad // tm,),
        in_specs=in_specs,
        out_specs=pl.BlockSpec((tm, coutp), lambda i: (i, 0)),
        compiler_params=pltpu.CompilerParams(
            dimension_semantics=("parallel",),
            vmem_limit_bytes=_VMEM_LIMIT),
    )(*args)
    return out[:m].reshape(n, h, wd, coutp)


def conv3x3_pallas(x_nhwc, w9, b2, tile_h=8):
    """3x3 conv, stride=1, padding=1, on a channel-padded NHWC map.

    x_nhwc: (N,H,W,Cp) f32; w9: (9*Cp, Cout_p) bf16; b2: (1, Cout_p) f32.
    Returns (N,H,W,Cout_p) f32.
    """
    n, h, w, cp = x_nhwc.shape
    coutp = w9.shape[1]
    th = min(tile_h, h)
    t = (h + th - 1) // th
    w8 = _round_up(w, _SUBLANE)          # lane/sublane-friendly output width
    wp = w8 + 2
    hp = t * th + 2
    xp = jnp.pad(x_nhwc, ((0, 0), (1, hp - 1 - h), (1, wp - 1 - w), (0, 0)))
    # Overlapping row-tiles with a 2-row halo (only the halo rows duplicate).
    tiles = jnp.stack([xp[:, i * th:i * th + th + 2] for i in range(t)], axis=1)
    # tiles: (N, T, th+2, Wp, Cp)

    out = pl.pallas_call(
        _conv3x3_kernel,
        out_shape=jax.ShapeDtypeStruct((n, t, th, w8, coutp), x_nhwc.dtype),
        grid=(n, t),
        in_specs=[
            pl.BlockSpec((None, None, th + 2, wp, cp),
                         lambda i, j: (i, j, 0, 0, 0)),
            pl.BlockSpec((9 * cp, coutp), lambda i, j: (0, 0)),  # grid-invariant
            pl.BlockSpec((1, coutp), lambda i, j: (0, 0)),       # grid-invariant
        ],
        out_specs=pl.BlockSpec((None, None, th, w8, coutp),
                               lambda i, j: (i, j, 0, 0, 0)),
        compiler_params=pltpu.CompilerParams(
            dimension_semantics=("parallel", "parallel"),
            vmem_limit_bytes=_VMEM_LIMIT),
    )(tiles, w9, b2)
    return out.reshape(n, t * th, w8, coutp)[:, :h, :w, :]


def nearest_upsample_nhwc(x, out_h, out_w):
    """F.interpolate(mode='nearest', size=(out_h, out_w)) on NHWC (pure gather glue)."""
    _, h, w, _ = x.shape
    rows = (jnp.arange(out_h) * h) // out_h
    cols = (jnp.arange(out_w) * w) // out_w
    return x[:, rows][:, :, cols]


def _prep_layer_weights(w3, b3, cp):
    """Pad 3x3 HWIO weight to (3,3,Cp,Cp), pack to (9*Cp, Cp) bf16; bias to (1,Cp) f32."""
    _, _, cin, cout = w3.shape
    w3p = jnp.pad(w3, ((0, 0), (0, 0), (0, cp - cin), (0, cp - cout)))
    w3p = w3p.reshape(9 * cp, cp).astype(jnp.bfloat16)
    b3p = jnp.pad(b3, (0, cp - cout)).reshape(1, cp).astype(jnp.float32)
    return w3p, b3p


# ------------------------------ FPN module ---------------------------------

def init_fpn_params(key, in_channels_list, out_channels, dtype=jnp.float32):
    """nn.Conv2d weights with kaiming_uniform_(a=1): bound = sqrt(3/fan_in); bias=0."""
    params = {"inner": [], "layer": []}
    for cin in in_channels_list:
        key, k1, k2 = jax.random.split(key, 3)
        bound1 = float(np.sqrt(3.0 / cin))
        w1 = jax.random.uniform(k1, (cin, out_channels), dtype,
                                minval=-bound1, maxval=bound1)
        b1 = jnp.zeros((out_channels,), dtype)
        bound3 = float(np.sqrt(3.0 / (out_channels * 9)))
        w3 = jax.random.uniform(k2, (3, 3, out_channels, out_channels), dtype,
                                minval=-bound3, maxval=bound3)
        b3 = jnp.zeros((out_channels,), dtype)
        params["inner"].append((w1, b1))
        params["layer"].append((w3, b3))
    return params


def fpn_forward(x_dict, params):
    """x_dict: OrderedDict[str, NCHW array], increasing depth order.
    Returns OrderedDict[str, NCHW array] (highest resolution first)."""
    names = list(x_dict.keys())
    xs = [jnp.transpose(v, (0, 2, 3, 1)) for v in x_dict.values()]  # NCHW -> NHWC
    out_channels = params["layer"][0][0].shape[-1]
    coutp = _round_up(out_channels, _LANE)

    w1, b1 = params["inner"][-1]
    last_inner = lateral_conv_pallas(xs[-1], w1, b1, coutp)
    w3p, b3p = _prep_layer_weights(*params["layer"][-1], coutp)
    results = [conv3x3_pallas(last_inner, w3p, b3p)]

    for idx in range(len(xs) - 2, -1, -1):
        h, wd = xs[idx].shape[1], xs[idx].shape[2]
        top_down = nearest_upsample_nhwc(last_inner, h, wd)
        w1, b1 = params["inner"][idx]
        # 1x1 lateral conv + top-down merge fused in one kernel call.
        last_inner = lateral_conv_pallas(xs[idx], w1, b1, coutp, top_down=top_down)
        w3p, b3p = _prep_layer_weights(*params["layer"][idx], coutp)
        results.insert(0, conv3x3_pallas(last_inner, w3p, b3p))

    # TODO(synk): extra_blocks (ExtraFPNBlock) is None in this setup; not implemented.
    results = [jnp.transpose(r[..., :out_channels], (0, 3, 1, 2)) for r in results]
    return OrderedDict(zip(names, results))


# --------------------------- pure-JAX reference -----------------------------

def _ref_conv(x_nhwc, w_hwio, b, pad):
    y = jax.lax.conv_general_dilated(
        x_nhwc, w_hwio, window_strides=(1, 1),
        padding=[(pad, pad), (pad, pad)],
        dimension_numbers=("NHWC", "HWIO", "NHWC"))
    return y + b


def fpn_forward_ref(x_dict, params):
    names = list(x_dict.keys())
    xs = [jnp.transpose(v, (0, 2, 3, 1)) for v in x_dict.values()]
    w1, b1 = params["inner"][-1]
    last_inner = _ref_conv(xs[-1], w1.reshape(1, 1, *w1.shape), b1, 0)
    w3, b3 = params["layer"][-1]
    results = [_ref_conv(last_inner, w3, b3, 1)]
    for idx in range(len(xs) - 2, -1, -1):
        w1, b1 = params["inner"][idx]
        inner_lateral = _ref_conv(xs[idx], w1.reshape(1, 1, *w1.shape), b1, 0)
        up = nearest_upsample_nhwc(last_inner,
                                   inner_lateral.shape[1], inner_lateral.shape[2])
        last_inner = inner_lateral + up
        w3, b3 = params["layer"][idx]
        results.insert(0, _ref_conv(last_inner, w3, b3, 1))
    results = [jnp.transpose(r, (0, 3, 1, 2)) for r in results]
    return OrderedDict(zip(names, results))


# ---------------------------------- main ------------------------------------

if __name__ == "__main__":
    key = jax.random.PRNGKey(0)

    in_channels_list = [8, 16, 32]
    out_channels = 8
    batch = 2
    spatial = [16, 8, 4]

    kp, kd = jax.random.split(key)
    params = init_fpn_params(kp, in_channels_list, out_channels)

    # Inputs in PyTorch NCHW layout, increasing depth order.
    x = OrderedDict()
    for i, (cin, s) in enumerate(zip(in_channels_list, spatial)):
        kd, k = jax.random.split(kd)
        x[f"feat{i}"] = jax.random.normal(k, (batch, cin, s, s), jnp.float32)

    out = fpn_forward(x, params)
    out = jax.tree_util.tree_map(jax.block_until_ready, out)

    ref = fpn_forward_ref(x, params)
    for name in out:
        assert out[name].shape == (batch, out_channels,
                                   x[name].shape[2], x[name].shape[3])
        # bf16 MXU operands (f32 accumulation) -> loosened tolerances vs f32 reference.
        np.testing.assert_allclose(np.asarray(out[name]), np.asarray(ref[name]),
                                   rtol=5e-2, atol=5e-2)

    print("KERNEL_OK")
</pallas_src>

<mosaic_0001>
module attributes {stable_mosaic.version = 11 : i64} {
  func.func @_lateral_kernel(%arg0: i32, %arg1: memref<32x128xf32, #tpu.memory_space<vmem>>, %arg2: memref<128x128xbf16, #tpu.memory_space<vmem>>, %arg3: memref<1x128xf32, #tpu.memory_space<vmem>>, %arg4: memref<32x128xf32, #tpu.memory_space<vmem>>) attributes {dimension_semantics = [#tpu.dimension_semantics<parallel>], iteration_bounds = array<i64: 1>, scalar_prefetch = 0 : i64, scratch_operands = 0 : i64, tpu.core_type = #tpu.core_type<tc>, window_params = [{transform_indices = @transform_0, window_bounds = array<i64: 32, 128>}, {pipeline_mode = #tpu.pipeline_mode<synchronous>, transform_indices = @transform_1, window_bounds = array<i64: 128, 128>}, {pipeline_mode = #tpu.pipeline_mode<synchronous>, transform_indices = @transform_2, window_bounds = array<i64: 1, 128>}, {transform_indices = @transform_3, window_bounds = array<i64: 32, 128>}]} {
    %c0 = arith.constant 0 : index
    %c0_0 = arith.constant 0 : index
    %0 = vector.load %arg1[%c0, %c0_0] : memref<32x128xf32, #tpu.memory_space<vmem>>, vector<32x128xf32>
    %1 = arith.truncf %0 : vector<32x128xf32> to vector<32x128xbf16>
    %c0_1 = arith.constant 0 : index
    %c0_2 = arith.constant 0 : index
    %2 = vector.load %arg2[%c0_1, %c0_2] : memref<128x128xbf16, #tpu.memory_space<vmem>>, vector<128x128xbf16>
    %cst = arith.constant dense<0.000000e+00> : vector<32x128xf32>
    %3 = tpu.matmul %1, %2, %cst {dimension_numbers = #tpu.dot_dimension_numbers<[1], [0], [0], [1], [0, 0, 1, 1], [], []>} : vector<32x128xbf16>, vector<128x128xbf16>, vector<32x128xf32> -> vector<32x128xf32>
    %c0_3 = arith.constant 0 : index
    %c0_4 = arith.constant 0 : index
    %4 = vector.load %arg3[%c0_3, %c0_4] : memref<1x128xf32, #tpu.memory_space<vmem>>, vector<1x128xf32>
    %5 = vector.broadcast %4 : vector<1x128xf32> to vector<32x128xf32>
    %6 = arith.addf %3, %5 : vector<32x128xf32>
    %c0_5 = arith.constant 0 : index
    %c0_6 = arith.constant 0 : index
    %7 = vector.load %arg4[%c0_5, %c0_6] : memref<32x128xf32, #tpu.memory_space<vmem>>, vector<32x128xf32>
    tpu.vector_store %arg4[%c0_5, %c0_6], %6 {strides = array<i32>} : memref<32x128xf32, #tpu.memory_space<vmem>>, vector<32x128xf32>,
    return
  }
  func.func @transform_0(%arg0: i32) -> (i32, i32) {
    %c0_i32 = arith.constant 0 : i32
    %c0_i32_0 = arith.constant 0 : i32
    return %arg0, %c0_i32 : i32, i32
  }
  func.func @transform_1(%arg0: i32) -> (i32, i32) {
    %c0_i32 = arith.constant 0 : i32
    %c0_i32_0 = arith.constant 0 : i32
    %c0_i32_1 = arith.constant 0 : i32
    return %c0_i32, %c0_i32_0 : i32, i32
  }
  func.func @transform_2(%arg0: i32) -> (i32, i32) {
    %c0_i32 = arith.constant 0 : i32
    %c0_i32_0 = arith.constant 0 : i32
    %c0_i32_1 = arith.constant 0 : i32
    return %c0_i32, %c0_i32_0 : i32, i32
  }
  func.func @transform_3(%arg0: i32) -> (i32, i32) {
    %c0_i32 = arith.constant 0 : i32
    %c0_i32_0 = arith.constant 0 : i32
    return %arg0, %c0_i32 : i32, i32
  }
}

</mosaic_0001>

<bundles_post_ra>
// kernel: tpu_custom_call.1
= control target key start
LH: loop header
LB: loop body
LE: loop exit
PB: predicated region body
PF: predicated region fallthrough
CT: control target
= control target key end

     0   :  { %8 = vsyncpa [#allocation3], 0  ;;  %s390_s0 = inlined_call_operand.hbm [shape: f32[32,128], index: 0, kind: input, shape index: {}]   ;;  %s391_s1 = inlined_call_operand.hbm [shape: bf16[128,128], index: 1, kind: input, shape index: {}]   ;;  %s392_s2 = inlined_call_operand.vmem [shape: f32[1,128], index: 2, kind: input, shape index: {}]   ;;  %s393_s3 = inlined_call_operand.hbm [shape: f32[32,128], index: 3, kind: output, shape index: {}]  }
   0x1   :  { %9 = vsyncpa [#allocation6], 0 }
   0x2   :  { %10 = vsyncpa [#allocation4], 0  ;;  %s318_s12 = smov [#allocation2]   ;;  %s246_s16 = scalar_lea.hbm %s390_s0, 512 }
   0x3   :  { %s16_s13 = sshll.u32 %s318_s12, 4  ;;  %p247_p0 = scmp.ne.s32.totalorder %s390_s0, %s246_s16  ;;  %s17_s13 = int_to_ptr.vmem [resolvable:$true] %s16_s13 }
   0x4   :  { %p250_p1 = scmp.lt.u32.totalorder %s246_s16, %s390_s0 }
   0x6   :  { %p252_p2 = pnand %p250_p1, %p247_p0 }
   0x8   :  { %255 = shalt.err (!%p252_p2)
}
   0x9   :  { %s256_s21 = scalar_lea.vmem %s17_s13, 512  ;;  %p261_p4 = scmp.lt.s32.totalorder %s17_s13, %s17_s13 }
   0xa   :  { %p257_p3 = scmp.ne.s32.totalorder %s17_s13, %s256_s21  ;;  %p262_p5 = scmp.lt.s32.totalorder %s256_s21, %s256_s21 }
   0xc   :  { %p263_p6 = por %p262_p5, %p261_p4 }
   0xe   :  { %p264_p7 = pnand %p263_p6, %p257_p3 }
  0x10   :  { %267 = shalt.err (!%p264_p7)
}
  0x11   :  { %s319_s22 = smov 128   ;;  %s320_s23 = smov 8  }
  0x12   :  { %22 = dma.hbm_to_vmem [thread:$0]  %s390_s0, 512, %s17_s13, [#allocation3], %s319_s22, %s319_s22, %s320_s23  }
  0x13   :  { %s321_s26 = smov [#allocation5]   ;;  %s268_s30 = scalar_lea.hbm %s391_s1, 1024 }
  0x14   :  { %s28_s27 = sshll.u32 %s321_s26, 4  ;;  %p269_p8 = scmp.ne.s32.totalorder %s391_s1, %s268_s30  ;;  %s29_s27 = int_to_ptr.vmem [resolvable:$true] %s28_s27 }
  0x15   :  { %p272_p9 = scmp.lt.u32.totalorder %s268_s30, %s391_s1 }
  0x17   :  { %p274_p10 = pnand %p272_p9, %p269_p8 }
  0x19   :  { %277 = shalt.err (!%p274_p10)
}
  0x1a   :  { %s278_s8 = scalar_lea.vmem %s29_s27, 1024  ;;  %p283_p12 = scmp.lt.s32.totalorder %s29_s27, %s29_s27 }
  0x1b   :  { %p279_p11 = scmp.ne.s32.totalorder %s29_s27, %s278_s8  ;;  %p284_p13 = scmp.lt.s32.totalorder %s278_s8, %s278_s8 }
  0x1d   :  { %p285_p0 = por %p284_p13, %p283_p12 }
  0x1f   :  { %p286_p1 = pnand %p285_p0, %p279_p11 }
  0x21   :  { %289 = shalt.err (!%p286_p1)
}
  0x22   :  { %s322_s0 = smov 64   ;;  %s323_s9 = smov 4  }
  0x23   :  { %34 = dma.hbm_to_vmem [thread:$0]  %s391_s1, 1024, %s29_s27, [#allocation6], %s322_s0, %s322_s0, %s323_s9  }
  0x24   :  { %312 = dma.done.wait [#allocation3], 512  }
  0x25   :  { %313 = vsyncadd [#allocation3], 4294966784 }
  0x26   :  { %314 = dma.done.wait [#allocation6], 1024  }
  0x27   :  { %315 = vsyncadd [#allocation6], 4294966272  ;;  %v238_v0 = vld [vmem:[#allocation5] sm:$0xff]   ;;  %v239_v1 = vld [vmem:[#allocation5 + $0x8] sm:$0xff]   ;;  %s324_s13 = smov [#allocation7]  }
  0x28   :  { %211 = vmatprep.subr.bf16.mxu0 %v238_v0  ;;  %v240_v2 = vld [vmem:[#allocation5 + $0x10] sm:$0xff]   ;;  %v241_v3 = vld [vmem:[#allocation5 + $0x18] sm:$0xff]   ;;  %v44_v4 = vld [vmem:[#allocation2] sm:$0xff]  ;;  %s179_s14 = sshll.u32 %s324_s13, 4  ;;  %s180_s14 = int_to_ptr.vmem [resolvable:$true] %s179_s14 }
  0x29   :  { %212 = vmatpush3.bf16.msra.mxu0 %v238_v0  ;;  %v45_v5 = vld [vmem:[#allocation2 + $0x8] sm:$0xff]  ;;  %v242_v7 = vld [vmem:[#allocation5 + $0x20] sm:$0xff]   ;;  %v244_v9 = vld [vmem:[#allocation5 + $0x30] sm:$0xff]   ;;  %s290_s15 = scalar_lea.vmem %s180_s14, 512  ;;  %p295_p3 = scmp.lt.s32.totalorder %s180_s14, %s180_s14 }
  0x2a   :  { %213 = vmatprep.subr.bf16.mxu0 %v239_v1  ;;  %v48_v6 = vpack.c.bf16 %v45_v5, %v44_v4  ;;  %v243_v8 = vld [vmem:[#allocation5 + $0x28] sm:$0xff]   ;;  %v245_v10 = vld [vmem:[#allocation5 + $0x38] sm:$0xff]   ;;  %v46_v11 = vld [vmem:[#allocation2 + $0x10] sm:$0xff]  ;;  %p291_p2 = scmp.ne.s32.totalorder %s180_s14, %s290_s15  ;;  %p296_p4 = scmp.lt.s32.totalorder %s290_s15, %s290_s15 }
  0x2b   :  { %v47_v12 = vld [vmem:[#allocation2 + $0x18] sm:$0xff]  ;;  %v192_v14 = vld [vmem:[%s392_s2] ss:$0 sm:$0xff] }
  0x2c   :  { %227 = vmatprep.mubr.bf16.mxu0 %v48_v6  ;;  %v49_v13 = vpack.c.bf16 %v47_v12, %v46_v11  ;;  %p297_p5 = por %p296_p4, %p295_p3 }
  0x2d   :  { %214 = vmatpush3.bf16.msra.mxu0 %v239_v1 }
  0x2e   :  { %215 = vmatprep.subr.bf16.mxu0 %v240_v2  ;;  %p298_p6 = pnand %p297_p5, %p291_p2 }
  0x31   :  { %216 = vmatpush3.bf16.msra.mxu0 %v240_v2 }
  0x32   :  { %217 = vmatprep.subr.bf16.mxu0 %v241_v3 }
  0x35   :  { %218 = vmatpush3.bf16.msra.mxu0 %v241_v3 }
  0x36   :  { %219 = vmatprep.subr.bf16.mxu0 %v242_v7 }
  0x39   :  { %220 = vmatpush3.bf16.msra.mxu0 %v242_v7 }
  0x3a   :  { %221 = vmatprep.subr.bf16.mxu0 %v243_v8 }
  0x3d   :  { %222 = vmatpush3.bf16.msra.mxu0 %v243_v8 }
  0x3e   :  { %223 = vmatprep.subr.bf16.mxu0 %v244_v9 }
  0x41   :  { %224 = vmatpush3.bf16.msra.mxu0 %v244_v9 }
  0x42   :  { %225 = vmatprep.subr.bf16.mxu0 %v245_v10 }
  0x45   :  { %226 = vmatpush3.bf16.msra.mxu0 %v245_v10 }
  0x48   :  { %228 = vmatmul.mubr.bf16.vlgmr.msra.gmra.mrb[0].mxu0 %v49_v13 }
 0x11b   :  { %v229_v15 = vpop.f32.mrb[0].mxu0 }
 0x11c   :  { %v164_v16 = vadd.f32 %v229_v15, %v192_v14  ;;  %v155_v17 = vpop.f32.mrb[1].mxu0 }
 0x11d   :  { %v156_v18 = vadd.f32 %v192_v14, %v155_v17  ;;  %v230_v19 = vpop.f32.mrb[2].mxu0 }
 0x11e   :  { %172 = vst [vmem:[#allocation7 + $0x10] sm:$0xff] %v164_v16  ;;  %v167_v20 = vadd.f32 %v230_v19, %v192_v14  ;;  %v158_v21 = vpop.f32.mrb[3].mxu0 }
 0x11f   :  { %170 = vst [vmem:[#allocation7] sm:$0xff] %v156_v18  ;;  %v159_v22 = vadd.f32 %v192_v14, %v158_v21 }
 0x120   :  { %173 = vst [vmem:[#allocation7 + $0x18] sm:$0xff] %v167_v20 }
 0x121   :  { %171 = vst [vmem:[#allocation7 + $0x8] sm:$0xff] %v159_v22 }
 0x122   :  { %301 = shalt.err (!%p298_p6)
}
 0x123   :  { %s302_s17 = scalar_lea.hbm %s393_s3, 512 }
 0x124   :  { %p303_p7 = scmp.ne.s32.totalorder %s393_s3, %s302_s17  ;;  %p306_p8 = scmp.lt.u32.totalorder %s302_s17, %s393_s3 }
 0x126   :  { %p308_p9 = pnand %p306_p8, %p303_p7 }
 0x128   :  { %311 = shalt.err (!%p308_p9)
}
 0x129   :  { %185 = dma.vmem_to_hbm [thread:$0]  %s180_s14, 512, %s393_s3, [#allocation4], %s319_s22, %s319_s22, %s320_s23  }
 0x12a   :  { %316 = dma.done.wait [#allocation4], 512  }
 0x12b   :  { %317 = vsyncadd [#allocation4], 4294966784 }
 0x12c   :  { %189 = vsyncpa [#allocation3], 1 }
 0x12d   :  { %190 = vsyncpa [#allocation6], 1 }
 0x12e   :  { %191 = vsyncpa [#allocation4], 1 }

</bundles_post_ra>
